<compile_context>
chip_gen: v6e
topology: v6e:2x2x1
jax: 0.10.0
libtpu: 0.0.40
codegen_flags: <defaults>
</compile_context>

<pallas_src>
import jax
import jax.numpy as jnp
from jax.experimental import pallas as pl
from jax.experimental.pallas import tpu as pltpu


def _mpu_v2_kernel(unary_ref, pair_ref, w_ref, b_ref, out_ref, gate_ref):
    # Shapes (per grid step):
    #   unary_ref: (1, Nu, D) f32   Nu in {1, N}
    #   pair_ref : (1, Np, D) f32   Np in {1, N}
    #   w_ref    : (D, F)  bf16     (resident across the batch grid)
    #   b_ref    : (1, F)  f32
    #   out_ref  : (1, N, D) f32
    #   gate_ref : (1, 1, N) f32    (lane-dense gate row)
    n = out_ref.shape[1]

    # ReLU in f32 (v5e has no bf16 VALU); cast only the MXU operands to bf16.
    u = jnp.maximum(unary_ref[0], 0.0).astype(jnp.bfloat16)   # (Nu, D)
    p = jnp.maximum(pair_ref[0], 0.0).astype(jnp.bfloat16)    # (Np, D)

    w = w_ref[...]                                            # (D, F) bf16
    bias = b_ref[...]                                         # (1, F) f32

    # Two back-to-back MXU dots against the resident W (no (2N, D) concat copy),
    # f32 accumulation, single bias broadcast each.
    gu = jnp.dot(u, w, preferred_element_type=jnp.float32) + bias   # (Nu, F) f32
    gp = jnp.dot(p, w, preferred_element_type=jnp.float32) + bias   # (Np, F) f32

    # gate[i] = sigmoid(sum_f gu[i, f] * gp[i, f]), produced directly as a
    # lane-dense (1, n) row: XLU transpose + sublane reduce + EUP sigmoid.
    # (The alternative skinny MXU row-sum is only a win if XLU binds.)
    s = gu * gp                                               # (n, F) f32 (bcast if 1-row)
    gate_row = jax.nn.sigmoid(
        jnp.sum(jnp.transpose(s), axis=0, keepdims=True))     # (1, n) f32
    gate_ref[0] = gate_row                                    # dense lane-wide store

    # Literal torch broadcast (needs n == D): out[i, j] = pair[i, j] * gate[j].
    # Re-read pair here instead of keeping it live across the matmul/transpose.
    p_raw = pair_ref[0]                                       # (Np, D) f32
    if p_raw.shape[0] != n:                                   # static 1-row expand case
        p_raw = jnp.broadcast_to(p_raw, (n, p_raw.shape[1]))
    out_ref[0] = p_raw * gate_row                             # VPU sublane-broadcast mul


def message_passing_unit_v2_batched(unary_term, pair_term, w, b):
    """Batched MessagePassingUnit_v2.forward.

    unary_term : (B, Nu, D) f32   (Nu == N, or 1 for the torch expand case)
    pair_term  : (B, Np, D) f32   (Np == N, or 1)
    w          : (D, F)           torch Linear weight, transposed
    b          : (F,)
    returns (output (B, N, D) f32, gate (B, N) f32)
    """
    bsz, nu, d = unary_term.shape
    bsz2, np_, d2 = pair_term.shape
    assert bsz == bsz2 and d == d2
    n = max(nu, np_)
    assert nu in (1, n) and np_ in (1, n)
    # torch's `gate.expand(N, D)` on a 1-D gate is only defined when N == D
    # (or the degenerate N == 1); enforce the same constraint.
    assert n == d or n == 1, "literal torch semantics require num_rows == input_dim"
    f = w.shape[1]
    assert w.shape == (d, f) and b.shape == (f,)

    unary_term = unary_term.astype(jnp.float32)
    pair_term = pair_term.astype(jnp.float32)
    w_bf16 = w.astype(jnp.bfloat16)                 # MXU operand; halves W HBM traffic
    b2d = b.astype(jnp.float32).reshape(1, f)

    cost = pl.CostEstimate(
        flops=2 * bsz * (nu + np_) * d * f,
        transcendentals=bsz * n,
        bytes_accessed=4 * bsz * ((nu + np_ + n) * d + n) + 2 * d * f + 4 * f,
    )

    out, gate = pl.pallas_call(
        _mpu_v2_kernel,
        out_shape=(
            jax.ShapeDtypeStruct((bsz, n, d), jnp.float32),   # output
            jax.ShapeDtypeStruct((bsz, 1, n), jnp.float32),   # gate (lane-dense rows)
        ),
        grid=(bsz,),
        in_specs=[
            pl.BlockSpec((1, nu, d), lambda i: (i, 0, 0)),    # unary (per-item)
            pl.BlockSpec((1, np_, d), lambda i: (i, 0, 0)),   # pair  (per-item)
            pl.BlockSpec((d, f), lambda i: (0, 0)),           # W  (resident)
            pl.BlockSpec((1, f), lambda i: (0, 0)),           # b  (resident)
        ],
        out_specs=(
            pl.BlockSpec((1, n, d), lambda i: (i, 0, 0)),
            pl.BlockSpec((1, 1, n), lambda i: (i, 0, 0)),
        ),
        compiler_params=pltpu.CompilerParams(
            dimension_semantics=("parallel",),                # v7x: shard batch over 2 TCs
            vmem_limit_bytes=32 * 1024 * 1024,
        ),
        cost_estimate=cost,
    )(unary_term, pair_term, w_bf16, b2d)

    return out, gate[:, 0, :]


def message_passing_unit_v2(unary_term, pair_term, w, b):
    """Single-instance wrapper matching the torch forward signature.

    unary_term, pair_term : (Nu, D) / (Np, D) f32 (row-count 1 handled in-kernel)
    returns (output (N, D), gate (N,))
    """
    out, gate = message_passing_unit_v2_batched(
        unary_term[None], pair_term[None], w, b)
    return out[0], gate[0]


if __name__ == "__main__":
    # Small shapes consistent with the module: N rows == input_dim (required by
    # the literal torch `expand`); 128 keeps every tile/transpose (8,128)-aligned.
    B = 8             # batch of independent MPU instances (one grid step each)
    N = 128           # number of (unary, pair) rows
    INPUT_DIM = 128   # self.fea_size (== N required by the literal expand)
    FILTER_DIM = 128  # self.filter_size (module default)

    key = jax.random.PRNGKey(0)
    k_u, k_p, k_w, k_b = jax.random.split(key, 4)

    unary = jax.random.normal(k_u, (B, N, INPUT_DIM), dtype=jnp.float32)
    pair = jax.random.normal(k_p, (B, N, INPUT_DIM), dtype=jnp.float32)

    # Deterministic Linear init (like torch: U(-1/sqrt(in), 1/sqrt(in))).
    bound = 1.0 / (INPUT_DIM ** 0.5)
    w = jax.random.uniform(k_w, (INPUT_DIM, FILTER_DIM), dtype=jnp.float32,
                           minval=-bound, maxval=bound)
    b = jax.random.uniform(k_b, (FILTER_DIM,), dtype=jnp.float32,
                           minval=-bound, maxval=bound)

    output, gate = message_passing_unit_v2_batched(unary, pair, w, b)
    jax.block_until_ready((output, gate))

    # Pure-JAX reference of the same semantics with matching bf16 MXU operands
    # (f32 accumulation), so tolerances stay tight.
    u_bf = jnp.maximum(unary, 0.0).astype(jnp.bfloat16)
    p_bf = jnp.maximum(pair, 0.0).astype(jnp.bfloat16)
    w_bf = w.astype(jnp.bfloat16)
    gu = jnp.einsum("bnd,df->bnf", u_bf, w_bf,
                    preferred_element_type=jnp.float32) + b
    gp = jnp.einsum("bnd,df->bnf", p_bf, w_bf,
                    preferred_element_type=jnp.float32) + b
    gate_ref = jax.nn.sigmoid(jnp.sum(gu * gp, axis=-1))      # (B, N)
    out_ref = pair * gate_ref[:, None, :]                     # torch expand: gate on last axis

    assert output.shape == (B, N, INPUT_DIM) and gate.shape == (B, N)
    assert jnp.allclose(gate, gate_ref, atol=1e-3, rtol=1e-3)
    assert jnp.allclose(output, out_ref, atol=1e-3, rtol=1e-3)

    # Torch-API single-instance path (same kernel, B == 1).
    out0, gate0 = message_passing_unit_v2(unary[0], pair[0], w, b)
    jax.block_until_ready((out0, gate0))
    assert jnp.allclose(out0, output[0], atol=1e-5, rtol=1e-5)
    assert jnp.allclose(gate0, gate[0], atol=1e-5, rtol=1e-5)

    print("KERNEL_OK")
</pallas_src>

<mosaic_0001>
module attributes {stable_mosaic.version = 11 : i64} {
  func.func @_mpu_v2_kernel(%arg0: i32, %arg1: memref<1x128x128xf32, #tpu.memory_space<vmem>>, %arg2: memref<1x128x128xf32, #tpu.memory_space<vmem>>, %arg3: memref<128x128xbf16, #tpu.memory_space<vmem>>, %arg4: memref<1x128xf32, #tpu.memory_space<vmem>>, %arg5: memref<1x128x128xf32, #tpu.memory_space<vmem>>, %arg6: memref<1x1x128xf32, #tpu.memory_space<vmem>>) attributes {dimension_semantics = [#tpu.dimension_semantics<parallel>], iteration_bounds = array<i64: 8>, scalar_prefetch = 0 : i64, scratch_operands = 0 : i64, tpu.core_type = #tpu.core_type<tc>, window_params = [{transform_indices = @transform_0, window_bounds = array<i64: 1, 128, 128>}, {transform_indices = @transform_1, window_bounds = array<i64: 1, 128, 128>}, {pipeline_mode = #tpu.pipeline_mode<synchronous>, transform_indices = @transform_2, window_bounds = array<i64: 128, 128>}, {pipeline_mode = #tpu.pipeline_mode<synchronous>, transform_indices = @transform_3, window_bounds = array<i64: 1, 128>}, {transform_indices = @transform_4, window_bounds = array<i64: 1, 128, 128>}, {transform_indices = @transform_5, window_bounds = array<i64: 1, 1, 128>}]} {
    %c0 = arith.constant 0 : index
    %c0_0 = arith.constant 0 : index
    %c0_1 = arith.constant 0 : index
    %0 = vector.load %arg1[%c0, %c0_0, %c0_1] : memref<1x128x128xf32, #tpu.memory_space<vmem>>, vector<1x128x128xf32>
    %1 = vector.shape_cast %0 : vector<1x128x128xf32> to vector<128x128xf32>
    %cst = arith.constant 0.000000e+00 : f32
    %2 = vector.broadcast %cst : f32 to vector<128x128xf32>
    %3 = arith.maximumf %1, %2 : vector<128x128xf32>
    %4 = arith.truncf %3 : vector<128x128xf32> to vector<128x128xbf16>
    %c0_2 = arith.constant 0 : index
    %c0_3 = arith.constant 0 : index
    %c0_4 = arith.constant 0 : index
    %5 = vector.load %arg2[%c0_2, %c0_3, %c0_4] : memref<1x128x128xf32, #tpu.memory_space<vmem>>, vector<1x128x128xf32>
    %6 = vector.shape_cast %5 : vector<1x128x128xf32> to vector<128x128xf32>
    %cst_5 = arith.constant 0.000000e+00 : f32
    %7 = vector.broadcast %cst_5 : f32 to vector<128x128xf32>
    %8 = arith.maximumf %6, %7 : vector<128x128xf32>
    %9 = arith.truncf %8 : vector<128x128xf32> to vector<128x128xbf16>
    %c0_6 = arith.constant 0 : index
    %c0_7 = arith.constant 0 : index
    %10 = vector.load %arg3[%c0_6, %c0_7] : memref<128x128xbf16, #tpu.memory_space<vmem>>, vector<128x128xbf16>
    %c0_8 = arith.constant 0 : index
    %c0_9 = arith.constant 0 : index
    %11 = vector.load %arg4[%c0_8, %c0_9] : memref<1x128xf32, #tpu.memory_space<vmem>>, vector<1x128xf32>
    %cst_10 = arith.constant dense<0.000000e+00> : vector<128x128xf32>
    %12 = tpu.matmul %4, %10, %cst_10 {dimension_numbers = #tpu.dot_dimension_numbers<[1], [0], [0], [1], [0, 0, 1, 1], [], []>} : vector<128x128xbf16>, vector<128x128xbf16>, vector<128x128xf32> -> vector<128x128xf32>
    %13 = vector.broadcast %11 : vector<1x128xf32> to vector<128x128xf32>
    %14 = arith.addf %12, %13 : vector<128x128xf32>
    %cst_11 = arith.constant dense<0.000000e+00> : vector<128x128xf32>
    %15 = tpu.matmul %9, %10, %cst_11 {dimension_numbers = #tpu.dot_dimension_numbers<[1], [0], [0], [1], [0, 0, 1, 1], [], []>} : vector<128x128xbf16>, vector<128x128xbf16>, vector<128x128xf32> -> vector<128x128xf32>
    %16 = vector.broadcast %11 : vector<1x128xf32> to vector<128x128xf32>
    %17 = arith.addf %15, %16 : vector<128x128xf32>
    %18 = arith.mulf %14, %17 : vector<128x128xf32>
    %19 = tpu.transpose %18, [1, 0] : vector<128x128xf32> -> vector<128x128xf32>
    %cst_12 = arith.constant dense<0.000000e+00> : vector<128xf32>
    %20 = vector.multi_reduction <add>, %19, %cst_12 [0] : vector<128x128xf32> to vector<128xf32>
    %21 = vector.shape_cast %20 : vector<128xf32> to vector<1x128xf32>
    %22 = arith.negf %21 : vector<1x128xf32>
    %23 = math.exp %22 : vector<1x128xf32>
    %cst_13 = arith.constant 1.000000e+00 : f32
    %24 = vector.broadcast %cst_13 : f32 to vector<1x128xf32>
    %25 = arith.addf %24, %23 : vector<1x128xf32>
    %26 = arith.divf %24, %25 : vector<1x128xf32>
    %c0_14 = arith.constant 0 : index
    %c0_15 = arith.constant 0 : index
    %c0_16 = arith.constant 0 : index
    %27 = vector.load %arg6[%c0_14, %c0_15, %c0_16] : memref<1x1x128xf32, #tpu.memory_space<vmem>>, vector<1x1x128xf32>
    %28 = vector.shape_cast %27 : vector<1x1x128xf32> to vector<1x128xf32>
    %29 = vector.shape_cast %26 : vector<1x128xf32> to vector<1x1x128xf32>
    tpu.vector_store %arg6[%c0_14, %c0_15, %c0_16], %29 {strides = array<i32>} : memref<1x1x128xf32, #tpu.memory_space<vmem>>, vector<1x1x128xf32>,
    %c0_17 = arith.constant 0 : index
    %c0_18 = arith.constant 0 : index
    %c0_19 = arith.constant 0 : index
    %30 = vector.load %arg2[%c0_17, %c0_18, %c0_19] : memref<1x128x128xf32, #tpu.memory_space<vmem>>, vector<1x128x128xf32>
    %31 = vector.shape_cast %30 : vector<1x128x128xf32> to vector<128x128xf32>
    %32 = vector.broadcast %26 : vector<1x128xf32> to vector<128x128xf32>
    %33 = arith.mulf %31, %32 : vector<128x128xf32>
    %c0_20 = arith.constant 0 : index
    %c0_21 = arith.constant 0 : index
    %c0_22 = arith.constant 0 : index
    %34 = vector.load %arg5[%c0_20, %c0_21, %c0_22] : memref<1x128x128xf32, #tpu.memory_space<vmem>>, vector<1x128x128xf32>
    %35 = vector.shape_cast %34 : vector<1x128x128xf32> to vector<128x128xf32>
    %36 = vector.shape_cast %33 : vector<128x128xf32> to vector<1x128x128xf32>
    tpu.vector_store %arg5[%c0_20, %c0_21, %c0_22], %36 {strides = array<i32>} : memref<1x128x128xf32, #tpu.memory_space<vmem>>, vector<1x128x128xf32>,
    return
  }
  func.func @transform_0(%arg0: i32) -> (i32, i32, i32) {
    %c0_i32 = arith.constant 0 : i32
    %c0_i32_0 = arith.constant 0 : i32
    %c0_i32_1 = arith.constant 0 : i32
    return %arg0, %c0_i32, %c0_i32_0 : i32, i32, i32
  }
  func.func @transform_1(%arg0: i32) -> (i32, i32, i32) {
    %c0_i32 = arith.constant 0 : i32
    %c0_i32_0 = arith.constant 0 : i32
    %c0_i32_1 = arith.constant 0 : i32
    return %arg0, %c0_i32, %c0_i32_0 : i32, i32, i32
  }
  func.func @transform_2(%arg0: i32) -> (i32, i32) {
    %c0_i32 = arith.constant 0 : i32
    %c0_i32_0 = arith.constant 0 : i32
    %c0_i32_1 = arith.constant 0 : i32
    return %c0_i32, %c0_i32_0 : i32, i32
  }
  func.func @transform_3(%arg0: i32) -> (i32, i32) {
    %c0_i32 = arith.constant 0 : i32
    %c0_i32_0 = arith.constant 0 : i32
    %c0_i32_1 = arith.constant 0 : i32
    return %c0_i32, %c0_i32_0 : i32, i32
  }
  func.func @transform_4(%arg0: i32) -> (i32, i32, i32) {
    %c0_i32 = arith.constant 0 : i32
    %c0_i32_0 = arith.constant 0 : i32
    %c0_i32_1 = arith.constant 0 : i32
    return %arg0, %c0_i32, %c0_i32_0 : i32, i32, i32
  }
  func.func @transform_5(%arg0: i32) -> (i32, i32, i32) {
    %c0_i32 = arith.constant 0 : i32
    %c0_i32_0 = arith.constant 0 : i32
    %c0_i32_1 = arith.constant 0 : i32
    return %arg0, %c0_i32, %c0_i32_0 : i32, i32, i32
  }
}

</mosaic_0001>

<bundles_post_ra>
// kernel: tpu_custom_call.1
= control target key start
LH: loop header
LB: loop body
LE: loop exit
PB: predicated region body
PF: predicated region fallthrough
CT: control target
= control target key end

     0   :  { %s1808_s0 = inlined_call_operand.hbm [shape: f32[8,128,128], index: 0, kind: input, shape index: {}]   ;;  %s1809_s1 = inlined_call_operand.hbm [shape: f32[8,128,128], index: 1, kind: input, shape index: {}]   ;;  %s1810_s2 = inlined_call_operand.hbm [shape: bf16[128,128], index: 2, kind: input, shape index: {}]   ;;  %s1811_s3 = inlined_call_operand.vmem [shape: f32[1,128], index: 3, kind: input, shape index: {}]   ;;  %s1812_s4 = inlined_call_operand.hbm [shape: f32[8,128,128], index: 4, kind: output, shape index: {0}]   ;;  %s1813_s5 = inlined_call_operand.hbm [shape: f32[8,1,128], index: 5, kind: output, shape index: {1}]  }
   0x1   :  { %1817 = sst [smem:[#allocation16_spill]] %s1808_s0 }
   0x2   :  { %1818 = sst [smem:[#allocation17_spill]] %s1810_s2 }
   0x3   :  { %11 = vsyncpa [#allocation3], 0 }
   0x4   :  { %13 = vsyncpa [#allocation3 + $0x1], 0 }
   0x5   :  { %14 = vsyncpa [#allocation6], 0 }
   0x6   :  { %16 = vsyncpa [#allocation6 + $0x1], 0 }
   0x7   :  { %17 = vsyncpa [#allocation4], 0 }
   0x8   :  { %19 = vsyncpa [#allocation4 + $0x1], 0 }
   0x9   :  { %20 = vsyncpa [#allocation10], 0 }
   0xa   :  { %22 = vsyncpa [#allocation10 + $0x1], 0  ;;  %s1383_s18 = smov 0   ;;  %s1385_s19 = smov 0  }
   0xb   :  { %s1387_s20 = smov 0   ;;  %s1389_s21 = smov 0  }
   0xc LB: > { %s1404_s22 = sadd.s32 4294967295, %s1340_s21   ;;  %s941_s23 = sadd.s32 4294967294, %s1340_s21   ;;  %s1340_s21 = sphi %s1389_s21, %s1836_s21   ;;  %s1336_s20 = sphi %s1387_s20, %s1835_s20   ;;  %s1332_s19 = sphi %s1385_s19, %s1834_s19   ;;  %s1328_s18 = sphi %s1383_s18, %s1833_s18  }
   0xd   : > { %p48_p0 = scmp.ne.s32.totalorder %s1332_s19, %s1328_s18  ;;  %p1814_p1 = scmp.eq.s32.totalorder %s1404_s22, 0 }
   0xe   : > { %p146_p3 = scmp.eq.s32.totalorder %s941_s23, 7  ;;  %p942_p5 = scmp.ge.s32.totalorder %s1340_s21, 1 }
   0xf   : > { %p1413_p4 = por %p1814_p1, %p48_p0  ;;  %p179_p7 = scmp.lt.s32.totalorder %s1340_s21, 9 }
  0x10   : > { %p1418_p6 = por %p146_p3, %p48_p0  ;;  %s1342_s27 = smov [#allocation7]  }
  0x11   : > { %s1819_s24 = scalar_select %p1413_p4, 1, 0 }
  0x12   : > { %s1820_s25 = scalar_select %p1418_p6, 1, 0 }
  0x13   : > { %p1423_p8 = pnand %p942_p5, %p179_p7  ;;  %s191_s28 = sshll.u32 %s1342_s27, 4  ;;  %s192_s28 = int_to_ptr.vmem [resolvable:$true] %s191_s28 }
  0x14   : > { %s1436_s30 = sadd.s32 1, %s1340_s21   ;;  %s35_s6 = sadd.s32 1, %s1336_s20 }
  0x15   : > { %p1083_p9 = pneg %p1423_p8  ;;  %s32_s7 = ssub.s32 %s1340_s21, %s1436_s30 }
  0x16   : > { %s1167_s8 = scalar_lea.vmem %s192_s28, 1024  ;;  %p1175_p3 = scmp.lt.s32.totalorder %s192_s28, %s192_s28 }
  0x17   : > { %p1431_p10 = pnand %p1083_p9, %p1814_p1  ;;  %p1168_p12 = scmp.ne.s32.totalorder %s192_s28, %s1167_s8 }
  0x18   : > { %p1176_p5 = scmp.lt.s32.totalorder %s1167_s8, %s1167_s8 }
  0x19   : > { %p1158_p11 = pneg %p1431_p10 }
  0x1a   : > { %p1177_p7 = por %p1176_p5, %p1175_p3 }
  0x1b   : > { %p1170_p13 = pnand %p1168_p12, %p1158_p11 }
  0x1d   : > { %p1171_p0 = pneg %p1170_p13 }
  0x1f   : > { %p1178_p2 = pnand %p1177_p7, %p1171_p0 }
  0x21   : > { %1181 = shalt.err (!%p1178_p2)
}
  0x22   : > { %s1343_s9 = smov 64   ;;  %s1344_s10 = smov 4  }
  0x23   : > { %s1823_s2 = sld [smem:[#allocation17_spill]]  ;;  %p33_p9 = scmp.eq.s32.totalorder %s32_s7, 0 }
  0x24   : > { %p42_p11 = scmp.ne.s32.totalorder %s1336_s20, %s1332_s19  ;;  %p43_p2 = scmp.eq.s32.totalorder %s1340_s21, 0 }
  0x25   : > { %p1102_p12 = scmp.lt.s32.totalorder %s1340_s21, 8  ;;  %p1824_p0 = scmp.eq.s32.totalorder %s1404_s22, 7 }
  0x26   : > { %s1453_s13 = scalar_select %p33_p9, %s1336_s20, %s35_s6  }
  0x27   : > { %p44_p13 = por %p43_p2, %p42_p11  ;;  %p1457_p3 = por %p1824_p0, %p42_p11 }
  0x28   : > { %s208_s15 = sand.u32 1, %s1336_s20   ;;  %s972_s16 = sshll.u32 %s1340_s21, 11 }
  0x29   : > { %1086 = dma.hbm_to_vmem [thread:$0]  (!%p1431_p10), %s1823_s2, 1024, %s192_s28, [#allocation6], %s1343_s9, %s1343_s9, %s1344_s10  }
  0x2a   : > { %s1825_s14 = scalar_select %p1457_p3, 1, 0 }
  0x2b   : > { %s1463_s17 = sshll.u32 %s208_s15, 7  ;;  %s1826_s0 = sld [smem:[#allocation16_spill]] }
  0x2c   : > { %s212_s29 = scalar_lea.vmem [#allocation2], %s1463_s17  ;;  %p1473_p10 = pnand %p1102_p12, %p44_p13 }
  0x2d   : > { %s219_s6 = sshll.u32 %s212_s29, 4  ;;  %s1479_s8 = scalar_lea.sflag [#allocation3], %s208_s15  ;;  %s1477_s6 = int_to_ptr.vmem [resolvable:$true] %s219_s6 }
  0x2e   : > { %p1184_p7 = pneg %p1473_p10 }
  0x31   : > { %s1470_s28 = scalar_lea.hbm %s1826_s0, %s972_s16  ;;  %s1187_s12 = scalar_lea.hbm %s1826_s0, 16384 }
  0x32   : > { %s1182_s9 = scalar_lea.hbm %s1470_s28, 2048  ;;  %p1188_p2 = scmp.lt.s32.totalorder %s1470_s28, %s1826_s0 }
  0x33   : > { %p1183_p5 = scmp.ne.s32.totalorder %s1470_s28, %s1182_s9  ;;  %p1189_p12 = scmp.lt.s32.totalorder %s1187_s12, %s1182_s9 }
  0x35   : > { %p1185_p9 = pnand %p1184_p7, %p1183_p5  ;;  %p1190_p13 = por %p1189_p12, %p1188_p2 }
  0x37   : > { %p1186_p11 = pneg %p1185_p9 }
  0x39   : > { %p1191_p0 = pnand %p1190_p13, %p1186_p11 }
  0x3b   : > { %1194 = shalt.err (!%p1191_p0)
}
  0x3c   : > { %s1195_s15 = scalar_lea.vmem %s1477_s6, 2048  ;;  %s1345_s29 = smov [#allocation2]  }
  0x3d   : > { %p1196_p1 = scmp.ne.s32.totalorder %s1477_s6, %s1195_s15  ;;  %s1200_s10 = sshll.u32 %s1345_s29, 4  ;;  %s1201_s10 = int_to_ptr.vmem [resolvable:$false] %s1200_s10 }
  0x3e   : > { %s1202_s11 = scalar_lea.vmem %s1201_s10, 4096  ;;  %p1203_p6 = scmp.lt.s32.totalorder %s1477_s6, %s1201_s10 }
  0x3f   : > { %p1198_p5 = pnand %p1196_p1, %p1184_p7  ;;  %p1204_p3 = scmp.lt.s32.totalorder %s1202_s11, %s1195_s15 }
  0x41   : > { %p1199_p9 = pneg %p1198_p5  ;;  %p1205_p4 = por %p1204_p3, %p1203_p6 }
  0x43   : > { %p1206_p2 = pnand %p1205_p4, %p1199_p9 }
  0x45   : > { %1209 = shalt.err (!%p1206_p2)
}
  0x46   : > { %s1346_s9 = smov 128   ;;  %s1347_s12 = smov 8  }
  0x47   : > { %1090 = dma.hbm_to_vmem [thread:$0]  (!%p1473_p10), %s1470_s28, 2048, %s1477_s6, %s1479_s8, %s1346_s9, %s1346_s9, %s1347_s12  }
  0x48   : > { %s1514_s15 = scalar_lea.hbm %s1809_s1, %s972_s16  ;;  %s233_s29 = scalar_lea.vmem [#allocation5], %s1463_s17 }
  0x49   : > { %s240_s10 = sshll.u32 %s233_s29, 4  ;;  %s229_s11 = sand.u32 1, %s1340_s21   ;;  %s1518_s10 = int_to_ptr.vmem [resolvable:$true] %s240_s10 }
  0x4a   : > { %s230_s0 = scalar_lea.sflag [#allocation6], %s229_s11  ;;  %s1210_s2 = scalar_lea.hbm %s1514_s15, 2048 }
  0x4b   : > { %p1211_p1 = scmp.ne.s32.totalorder %s1514_s15, %s1210_s2  ;;  %s1215_s16 = scalar_lea.hbm %s1809_s1, 16384 }
  0x4c   : > { %p1216_p3 = scmp.lt.s32.totalorder %s1514_s15, %s1809_s1  ;;  %p1217_p11 = scmp.lt.s32.totalorder %s1215_s16, %s1210_s2 }
  0x4d   : > { %p1213_p4 = pnand %p1211_p1, %p1184_p7 }
  0x4e   : > { %p1218_p12 = por %p1217_p11, %p1216_p3 }
  0x4f   : > { %p1214_p6 = pneg %p1213_p4 }
  0x51   : > { %p1219_p13 = pnand %p1218_p12, %p1214_p6 }
  0x53   : > { %1222 = shalt.err (!%p1219_p13)
}
  0x54   : > { %s1223_s17 = scalar_lea.vmem %s1518_s10, 2048  ;;  %s1348_s27 = smov [#allocation5]  }
  0x55   : > { %p1224_p0 = scmp.ne.s32.totalorder %s1518_s10, %s1223_s17  ;;  %s1228_s29 = sshll.u32 %s1348_s27, 4  ;;  %s1229_s29 = int_to_ptr.vmem [resolvable:$false] %s1228_s29 }
  0x56   : > { %s1230_s11 = scalar_lea.vmem %s1229_s29, 4096  ;;  %p1231_p2 = scmp.lt.s32.totalorder %s1518_s10, %s1229_s29 }
  0x57   : > { %p1226_p5 = pnand %p1224_p0, %p1184_p7  ;;  %p1232_p1 = scmp.lt.s32.totalorder %s1230_s11, %s1223_s17 }
  0x59   : > { %p1227_p9 = pneg %p1226_p5  ;;  %p1233_p4 = por %p1232_p1, %p1231_p2 }
  0x5b   : > { %p1234_p3 = pnand %p1233_p4, %p1227_p9 }
  0x5d   : > { %1237 = shalt.err (!%p1234_p3)
}
  0x5e   : > { %1093 = dma.hbm_to_vmem [thread:$0]  (!%p1473_p10), %s1514_s15, 2048, %s1518_s10, %s230_s0, %s1346_s9, %s1346_s9, %s1347_s12  }
  0x5f   : > { %252 = sbr.rel (%p1423_p8) target bundleno = 607 (0x25f), region = 36  ;;  %s1548_s2 = sand.u32 (!%p1423_p8), 1, %s1332_s19  }
  0x60   : > { %s1551_s28 = sshll.u32 (!%p1423_p8), %s1548_s2, 7  ;;  %s255_s6 = scalar_lea.sflag (!%p1423_p8), [#allocation3], %s1548_s2 }
  0x61   : > { %s1555_s7 = scalar_lea.vmem (!%p1423_p8), [#allocation2], %s1551_s28  ;;  %p1828_p7 = scmp.ne.s32.totalorder (!%p1423_p8), %s1819_s24, 0 }
  0x64   : > { %1307 = dma.done.wait (%p1828_p7), %s255_s6, 2048  }
  0x65   : > { %1309 = vsyncadd (%p1828_p7), %s255_s6, 4294965248  ;;  %s263_s0 = sand.u32 1, %s1404_s22   ;;  %s1563_s9 = scalar_lea.vmem [#allocation5], %s1551_s28 }
  0x66   : > { %s264_s26 = scalar_lea.sflag [#allocation6], %s263_s0 }
  0x67   : > { %1311 = dma.done.wait (%p1828_p7), %s264_s26, 2048  }
  0x68   : > { %1313 = vsyncadd (%p1828_p7), %s264_s26, 4294965248  ;;  %p1829_p8 = scmp.eq.s32.totalorder %s1404_s22, 0 }
  0x6a   : > { %1315 = dma.done.wait (%p1829_p8), [#allocation6], 1024   ;;  %p1830_p10 = pmov %p1829_p8 }
  0x6b   : > { %v1144_v0 = vld [vmem:[#allocation7 + $0x38] sm:$0xff]   ;;  %v1145_v1 = vld [vmem:[#allocation7 + $0x30] sm:$0xff]   ;;  %v1146_v2 = vld [vmem:[#allocation7 + $0x28] sm:$0xff]   ;;  %s969_s15 = sshll.u32 %s1404_s22, 4  ;;  %s306_s10 = scalar_lea.vmem [#allocation9], %s1548_s2 }
  0x6c   : > { %1317 = vsyncadd (%p1830_p10), [#allocation6], 4294966272  ;;  %1007 = vmatprep.subr.bf16.mxu0 %v1144_v0  ;;  %1039 = vmatprep.subr.bf16.mxu1 %v1144_v0  ;;  %v1147_v3 = vld [vmem:[#allocation7 + $0x20] sm:$0xff]   ;;  %v309_v5 = vld [vmem:[%s1555_s7 + $0x8] sm:$0xff]  ;;  %s811_s16 = sshll.u32 %s306_s10, 4  ;;  %s1695_s17 = scalar_lea.hbm %s1813_s5, %s969_s15  ;;  %s1697_s16 = int_to_ptr.vmem [resolvable:$true] %s811_s16 }
  0x6d   : > { %1008 = vmatpush3.bf16.msra.mxu0 %v1144_v0  ;;  %1040 = vmatpush3.bf16.msra.mxu1 %v1144_v0  ;;  %v308_v4 = vld [vmem:[%s1555_s7] sm:$0xff]  ;;  %v325_v8 = vmax.f32 %v309_v5, 0.0  ;;  %v1579_v9 = vld [vmem:[%s1563_s9 + $0x8] sm:$0xff]  ;;  %v1148_v13 = vld [vmem:[#allocation7 + $0x18] sm:$0xff]   ;;  %s974_s27 = sshll.u32 %s1404_s22, 11  ;;  %s1701_s29 = scalar_lea.vmem [#allocation8], %s1551_s28 }
  0x6e   : > { %1009 = vmatprep.subr.bf16.mxu0 %v1145_v1  ;;  %1041 = vmatprep.subr.bf16.mxu1 %v1145_v1  ;;  %v1576_v6 = vld [vmem:[%s1563_s9] sm:$0xff]  ;;  %v324_v7 = vmax.f32 %v308_v4, 0.0  ;;  %v365_v11 = vmax.f32 %v1579_v9, 0.0  ;;  %v1149_v15 = vld [vmem:[#allocation7 + $0x10] sm:$0xff]   ;;  %v1150_v16 = vld [vmem:[#allocation7 + $0x8] sm:$0xff]   ;;  %s795_s11 = sshll.u32 %s1701_s29, 4  ;;  %s1750_s11 = int_to_ptr.vmem [resolvable:$true] %s795_s11 }
  0x6f   : > { %v364_v10 = vmax.f32 %v1576_v6, 0.0  ;;  %v1151_v17 = vld [vmem:[#allocation7] sm:$0xff]   ;;  %v310_v18 = vld [vmem:[%s1555_s7 + $0x10] sm:$0xff]  ;;  %v311_v19 = vld [vmem:[%s1555_s7 + $0x18] sm:$0xff]  ;;  %s783_s28 = scalar_lea.sflag [#allocation10], %s1548_s2  ;;  %s1238_s6 = scalar_lea.vmem %s1697_s16, 16 }
  0x70   : > { %v340_v12 = vpack.c.bf16 %v325_v8, %v324_v7  ;;  %v1586_v20 = vld [vmem:[%s1563_s9 + $0x10] sm:$0xff]  ;;  %v1589_v21 = vld [vmem:[%s1563_s9 + $0x18] sm:$0xff]  ;;  %v312_v22 = vld [vmem:[%s1555_s7 + $0x20] sm:$0xff]  ;;  %v326_v26 = vmax.f32 %v310_v18, 0.0  ;;  %v327_v27 = vmax.f32 %v311_v19, 0.0  ;;  %p1239_p6 = scmp.ne.s32.totalorder %s1697_s16, %s1238_s6  ;;  %p1831_p11 = scmp.ne.s32.totalorder %s1825_s14, 0 }
  0x71   : > { %1010 = vmatpush3.bf16.msra.mxu0 %v1145_v1  ;;  %1042 = vmatpush3.bf16.msra.mxu1 %v1145_v1  ;;  %v380_v14 = vpack.c.bf16 %v365_v11, %v364_v10  ;;  %v313_v23 = vld [vmem:[%s1555_s7 + $0x28] sm:$0xff]  ;;  %v1594_v24 = vld [vmem:[%s1563_s9 + $0x20] sm:$0xff]  ;;  %v366_v28 = vmax.f32 %v1586_v20, 0.0  ;;  %v367_v29 = vmax.f32 %v1589_v21, 0.0  ;;  %v328_v30 = vmax.f32 %v312_v22, 0.0  ;;  %v314_v36 = vld [vmem:[%s1555_s7 + $0x30] sm:$0xff] }
  0x72   : > { %1011 = vmatprep.subr.bf16.mxu0 %v1146_v2  ;;  %1043 = vmatprep.subr.bf16.mxu1 %v1146_v2  ;;  %v1597_v25 = vld [vmem:[%s1563_s9 + $0x28] sm:$0xff]  ;;  %v329_v31 = vmax.f32 %v313_v23, 0.0  ;;  %v368_v32 = vmax.f32 %v1594_v24, 0.0  ;;  %v341_v34 = vpack.c.bf16 %v327_v27, %v326_v26  ;;  %v315_v37 = vld [vmem:[%s1555_s7 + $0x38] sm:$0xff]  ;;  %v1606_v40 = vld [vmem:[%s1563_s9 + $0x30] sm:$0xff]  ;;  %v330_v46 = vmax.f32 %v314_v36, 0.0  ;;  %p1240_p12 = pnand %p1239_p6, %p1831_p11 }
  0x73   : > { %1023 = vmatprep.mubr.bf16.mxu0 %v340_v12  ;;  %1055 = vmatprep.mubr.bf16.mxu1 %v380_v14  ;;  %v369_v33 = vmax.f32 %v1597_v25, 0.0  ;;  %v381_v35 = vpack.c.bf16 %v367_v29, %v366_v28  ;;  %v1609_v41 = vld [vmem:[%s1563_s9 + $0x38] sm:$0xff]  ;;  %v316_v42 = vld [vmem:[%s1555_s7 + $0x40] sm:$0xff]  ;;  %v317_v43 = vld [vmem:[%s1555_s7 + $0x48] sm:$0xff]  ;;  %v331_v47 = vmax.f32 %v315_v37, 0.0  ;;  %v370_v48 = vmax.f32 %v1606_v40, 0.0 }
  0x74   : > { %v342_v38 = vpack.c.bf16 %v329_v31, %v328_v30  ;;  %v1614_v44 = vld [vmem:[%s1563_s9 + $0x40] sm:$0xff]  ;;  %v1617_v45 = vld [vmem:[%s1563_s9 + $0x48] sm:$0xff]  ;;  %v371_v49 = vmax.f32 %v1609_v41, 0.0  ;;  %v332_v50 = vmax.f32 %v316_v42, 0.0  ;;  %v333_v51 = vmax.f32 %v317_v43, 0.0  ;;  %v318_v56 = vld [vmem:[%s1555_s7 + $0x50] sm:$0xff]  ;;  %p1241_p13 = pneg %p1240_p12 }
  0x75   : > { %1012 = vmatpush3.bf16.msra.mxu0 %v1146_v2  ;;  %1044 = vmatpush3.bf16.msra.mxu1 %v1146_v2  ;;  %v382_v39 = vpack.c.bf16 %v369_v33, %v368_v32  ;;  %v372_v52 = vmax.f32 %v1614_v44, 0.0  ;;  %v373_v53 = vmax.f32 %v1617_v45, 0.0  ;;  %v343_v54 = vpack.c.bf16 %v331_v47, %v330_v46  ;;  %v319_v57 = vld [vmem:[%s1555_s7 + $0x58] sm:$0xff]  ;;  %v1626_v60 = vld [vmem:[%s1563_s9 + $0x50] sm:$0xff]  ;;  %v320_v62 = vld [vmem:[%s1555_s7 + $0x60] sm:$0xff] }
  0x76   : > { %1013 = vmatprep.subr.bf16.mxu0 %v1147_v3  ;;  %1045 = vmatprep.subr.bf16.mxu1 %v1147_v3  ;;  %v383_v55 = vpack.c.bf16 %v371_v49, %v370_v48  ;;  %v344_v58 = vpack.c.bf16 %v333_v51, %v332_v50  ;;  %v1629_v61 = vld [vmem:[%s1563_s9 + $0x58] sm:$0xff]  ;;  %v321_v63 = vld [vmem:[%s1555_s7 + $0x68] sm:$0xff]  ;;  %v1634_v0 = vld [vmem:[%s1563_s9 + $0x60] sm:$0xff]  ;;  %v334_v2 = vmax.f32 %v318_v56, 0.0  ;;  %v374_v4 = vmax.f32 %v1626_v60, 0.0 }
  0x77   : > { %v384_v59 = vpack.c.bf16 %v373_v53, %v372_v52  ;;  %v1637_v1 = vld [vmem:[%s1563_s9 + $0x68] sm:$0xff]  ;;  %v375_v5 = vmax.f32 %v1629_v61, 0.0  ;;  %v336_v7 = vmax.f32 %v320_v62, 0.0  ;;  %v337_v8 = vmax.f32 %v321_v63, 0.0  ;;  %v322_v14 = vld [vmem:[%s1555_s7 + $0x70] sm:$0xff]  ;;  %v1649_v19 = vld [vmem:[%s1563_s9 + $0x78] sm:$0xff] }
  0x78   : > { %v376_v10 = vmax.f32 %v1634_v0, 0.0  ;;  %v377_v11 = vmax.f32 %v1637_v1, 0.0  ;;  %v1646_v18 = vld [vmem:[%s1563_s9 + $0x70] sm:$0xff]  ;;  %v338_v22 = vmax.f32 %v322_v14, 0.0  ;;  %v379_v27 = vmax.f32 %v1649_v19, 0.0 }
  0x79   : > { %1014 = vmatpush3.bf16.msra.mxu0 %v1147_v3  ;;  %1046 = vmatpush3.bf16.msra.mxu1 %v1147_v3  ;;  %v335_v3 = vmax.f32 %v319_v57, 0.0  ;;  %v378_v26 = vmax.f32 %v1646_v18, 0.0  ;;  %v1656_v32 = vld [vmem:[%s1811_s3] ss:$0 sm:$0xff] }
  0x7a   : > { %1015 = vmatprep.subr.bf16.mxu0 %v1148_v13  ;;  %1047 = vmatprep.subr.bf16.mxu1 %v1148_v13 }
  0x7b   : > { %v345_v12 = vpack.c.bf16 %v335_v3, %v334_v2  ;;  %v387_v29 = vpack.c.bf16 %v379_v27, %v378_v26 }
  0x7d   : > { %1016 = vmatpush3.bf16.msra.mxu0 %v1148_v13  ;;  %1048 = vmatpush3.bf16.msra.mxu1 %v1148_v13  ;;  %v385_v13 = vpack.c.bf16 %v375_v5, %v374_v4 }
  0x7e   : > { %1017 = vmatprep.subr.bf16.mxu0 %v1149_v15  ;;  %1049 = vmatprep.subr.bf16.mxu1 %v1149_v15 }
  0x81   : > { %1018 = vmatpush3.bf16.msra.mxu0 %v1149_v15  ;;  %1050 = vmatpush3.bf16.msra.mxu1 %v1149_v15  ;;  %v346_v15 = vpack.c.bf16 %v337_v8, %v336_v7 }
  0x82   : > { %1019 = vmatprep.subr.bf16.mxu0 %v1150_v16  ;;  %1051 = vmatprep.subr.bf16.mxu1 %v1150_v16 }
  0x85   : > { %1020 = vmatpush3.bf16.msra.mxu0 %v1150_v16  ;;  %1052 = vmatpush3.bf16.msra.mxu1 %v1150_v16  ;;  %v386_v16 = vpack.c.bf16 %v377_v11, %v376_v10 }
  0x86   : > { %1021 = vmatprep.subr.bf16.mxu0 %v1151_v17  ;;  %1053 = vmatprep.subr.bf16.mxu1 %v1151_v17 }
  0x89   : > { %1022 = vmatpush3.bf16.msra.mxu0 %v1151_v17  ;;  %1054 = vmatpush3.bf16.msra.mxu1 %v1151_v17  ;;  %v323_v17 = vld [vmem:[%s1555_s7 + $0x78] sm:$0xff]  ;;  %s1349_s7 = smov [#allocation9]  }
  0x8a   : > { %v339_v23 = vmax.f32 %v323_v17, 0.0  ;;  %s1242_s0 = sshll.u32 %s1349_s7, 4  ;;  %s1243_s0 = int_to_ptr.vmem [resolvable:$false] %s1242_s0 }
  0x8b   : > { %s1244_s26 = scalar_lea.vmem %s1243_s0, 32  ;;  %p1245_p0 = scmp.lt.s32.totalorder %s1697_s16, %s1243_s0 }
  0x8c   : > { %1024 = vmatmul.mubr.bf16.vlgmr.msra.gmra.mxu0 %v341_v34  ;;  %1056 = vmatmul.mubr.bf16.vlgmr.msra.gmra.mxu1 %v381_v35  ;;  %v347_v28 = vpack.c.bf16 %v339_v23, %v338_v22  ;;  %p1246_p5 = scmp.lt.s32.totalorder %s1244_s26, %s1238_s6 }
  0x8d   : > { %1027 = vmatprep.mubr.bf16.mxu0 %v342_v38  ;;  %1059 = vmatprep.mubr.bf16.mxu1 %v382_v39 }
  0x8e   : > { %p1247_p9 = por %p1246_p5, %p1245_p0 }
  0x90   : > { %p1248_p2 = pnand %p1247_p9, %p1241_p13 }
  0x94   : > { %1028 = vmatmul.mubr.bf16.gmra.mxu0 %v343_v54  ;;  %1060 = vmatmul.mubr.bf16.gmra.mxu1 %v383_v55 }
  0x95   : > { %1031 = vmatprep.mubr.bf16.mxu0 %v344_v58  ;;  %1063 = vmatprep.mubr.bf16.mxu1 %v384_v59 }
  0x9c   : > { %1032 = vmatmul.mubr.bf16.gmra.mxu0 %v345_v12  ;;  %1064 = vmatmul.mubr.bf16.gmra.mxu1 %v385_v13 }
  0x9d   : > { %1035 = vmatprep.mubr.bf16.mxu0 %v346_v15  ;;  %1067 = vmatprep.mubr.bf16.mxu1 %v386_v16 }
  0xa4   : > { %1036 = vmatmul.mubr.bf16.gmra.mxu0 %v347_v28  ;;  %1068 = vmatmul.mubr.bf16.gmra.mxu1 %v387_v29 }
 0x14c   : > { %v1025_v30 = vpop.f32.mrf.mxu0  ;;  %v1057_v31 = vpop.f32.mrf.mxu1 }
 0x14d   : > { %v502_v50 = vadd.f32 %v1025_v30, %v1656_v32  ;;  %v599_v51 = vadd.f32 %v1057_v31, %v1656_v32 }
 0x14e   : > { %v493_v33 = vpop.f32.mrf.mxu0  ;;  %v590_v34 = vpop.f32.mrf.mxu1 }
 0x14f   : > { %v494_v35 = vadd.f32 %v1656_v32, %v493_v33  ;;  %v591_v36 = vadd.f32 %v1656_v32, %v590_v34  ;;  %v655_v57 = vmul.f32 %v599_v51, %v502_v50 }
 0x150   : > { %v1026_v37 = vpop.f32.mrf.mxu0  ;;  %v1058_v38 = vpop.f32.mrf.mxu1 }
 0x151   : > { %v653_v39 = vmul.f32 %v591_v36, %v494_v35  ;;  %v505_v55 = vadd.f32 %v1026_v37, %v1656_v32  ;;  %v602_v56 = vadd.f32 %v1058_v38, %v1656_v32 }
 0x152   : > { %v496_v42 = vpop.f32.mrf.mxu0  ;;  %v593_v43 = vpop.f32.mrf.mxu1 }
 0x153   : > { %v497_v46 = vadd.f32 %v1656_v32, %v496_v42  ;;  %v594_v47 = vadd.f32 %v1656_v32, %v593_v43  ;;  %669 = vxpose.xlu0.b32.start [1/16] %v653_v39, 128  ;;  %v656_v2 = vmul.f32 %v602_v56, %v505_v55 }
 0x154   : > { %v1029_v48 = vpop.f32.mrf.mxu0  ;;  %v1061_v49 = vpop.f32.mrf.mxu1 }
 0x155   : > { %v654_v52 = vmul.f32 %v594_v47, %v497_v46  ;;  %v518_v12 = vadd.f32 %v1029_v48, %v1656_v32  ;;  %v615_v13 = vadd.f32 %v1061_v49, %v1656_v32 }
 0x156   : > { %v509_v53 = vpop.f32.mrf.mxu0  ;;  %v606_v54 = vpop.f32.mrf.mxu1 }
 0x157   : > { %670 = vxpose.xlu0.b32.cont [2/16] %v654_v52, 128  ;;  %v510_v62 = vadd.f32 %v1656_v32, %v509_v53  ;;  %v607_v63 = vadd.f32 %v1656_v32, %v606_v54  ;;  %v659_v23 = vmul.f32 %v615_v13, %v518_v12 }
 0x158   : > { %v1030_v58 = vpop.f32.mrf.mxu0  ;;  %v1062_v59 = vpop.f32.mrf.mxu1 }
 0x159   : > { %v657_v8 = vmul.f32 %v607_v63, %v510_v62  ;;  %v521_v17 = vadd.f32 %v1030_v58, %v1656_v32  ;;  %v618_v22 = vadd.f32 %v1062_v59, %v1656_v32 }
 0x15a   : > { %v512_v3 = vpop.f32.mrf.mxu0  ;;  %v609_v4 = vpop.f32.mrf.mxu1 }
 0x15b   : > { %671 = vxpose.xlu0.b32.cont [3/16] %v655_v57, 128  ;;  %v513_v5 = vadd.f32 %v1656_v32, %v512_v3  ;;  %v610_v7 = vadd.f32 %v1656_v32, %v609_v4  ;;  %v660_v30 = vmul.f32 %v618_v22, %v521_v17 }
 0x15c   : > { %v1033_v10 = vpop.f32.mrf.mxu0  ;;  %v1065_v11 = vpop.f32.mrf.mxu1 }
 0x15d   : > { %v658_v14 = vmul.f32 %v610_v7, %v513_v5  ;;  %v534_v39 = vadd.f32 %v1033_v10, %v1656_v32  ;;  %v631_v42 = vadd.f32 %v1065_v11, %v1656_v32 }
 0x15e   : > { %v525_v15 = vpop.f32.mrf.mxu0  ;;  %v622_v16 = vpop.f32.mrf.mxu1 }
 0x15f   : > { %672 = vxpose.xlu0.b32.cont [4/16] %v656_v2, 128  ;;  %v526_v28 = vadd.f32 %v1656_v32, %v525_v15  ;;  %v623_v29 = vadd.f32 %v1656_v32, %v622_v16  ;;  %v663_v50 = vmul.f32 %v631_v42, %v534_v39 }
 0x160   : > { %v1034_v26 = vpop.f32.mrf.mxu0  ;;  %v1066_v27 = vpop.f32.mrf.mxu1 }
 0x161   : > { %v661_v36 = vmul.f32 %v623_v29, %v526_v28  ;;  %v537_v48 = vadd.f32 %v1034_v26, %v1656_v32  ;;  %v634_v49 = vadd.f32 %v1066_v27, %v1656_v32 }
 0x162   : > { %v528_v31 = vpop.f32.mrf.mxu0  ;;  %v625_v33 = vpop.f32.mrf.mxu1 }
 0x163   : > { %673 = vxpose.xlu0.b32.cont [5/16] %v657_v8, 128  ;;  %v529_v34 = vadd.f32 %v1656_v32, %v528_v31  ;;  %v626_v35 = vadd.f32 %v1656_v32, %v625_v33  ;;  %v664_v55 = vmul.f32 %v634_v49, %v537_v48 }
 0x164   : > { %v1037_v37 = vpop.f32.mrf.mxu0  ;;  %v1069_v38 = vpop.f32.mrf.mxu1 }
 0x165   : > { %v662_v43 = vmul.f32 %v626_v35, %v529_v34  ;;  %v550_v63 = vadd.f32 %v1037_v37, %v1656_v32  ;;  %v647_v2 = vadd.f32 %v1069_v38, %v1656_v32 }
 0x166   : > { %v541_v46 = vpop.f32.mrf.mxu0  ;;  %v638_v47 = vpop.f32.mrf.mxu1 }
 0x167   : > { %674 = vxpose.xlu0.b32.cont [6/16] %v658_v14, 128  ;;  %v542_v53 = vadd.f32 %v1656_v32, %v541_v46  ;;  %v639_v54 = vadd.f32 %v1656_v32, %v638_v47  ;;  %v667_v7 = vmul.f32 %v647_v2, %v550_v63 }
 0x168   : > { %v1038_v51 = vpop.f32.mrf.mxu0  ;;  %v1070_v52 = vpop.f32.mrf.mxu1 }
 0x169   : > { %v665_v62 = vmul.f32 %v639_v54, %v542_v53  ;;  %v553_v4 = vadd.f32 %v1038_v51, %v1656_v32  ;;  %v650_v5 = vadd.f32 %v1070_v52, %v1656_v32 }
 0x16a   : > { %v544_v56 = vpop.f32.mrf.mxu0  ;;  %v641_v57 = vpop.f32.mrf.mxu1 }
 0x16b   : > { %675 = vxpose.xlu0.b32.cont [7/16] %v659_v23, 128  ;;  %v545_v58 = vadd.f32 %v1656_v32, %v544_v56  ;;  %v642_v59 = vadd.f32 %v1656_v32, %v641_v57  ;;  %v668_v8 = vmul.f32 %v650_v5, %v553_v4 }
 0x16d   : > { %v666_v3 = vmul.f32 %v642_v59, %v545_v58 }
 0x16f   : > { %676 = vxpose.xlu0.b32.cont [8/16] %v660_v30, 128 }
 0x173   : > { %677 = vxpose.xlu0.b32.cont [9/16] %v661_v36, 128 }
 0x177   : > { %678 = vxpose.xlu0.b32.cont [10/16] %v662_v43, 128 }
 0x17b   : > { %679 = vxpose.xlu0.b32.cont [11/16] %v663_v50, 128 }
 0x17f   : > { %680 = vxpose.xlu0.b32.cont [12/16] %v664_v55, 128 }
 0x183   : > { %681 = vxpose.xlu0.b32.cont [13/16] %v665_v62, 128 }
 0x187   : > { %682 = vxpose.xlu0.b32.cont [14/16] %v666_v3, 128 }
 0x18b   : > { %683 = vxpose.xlu0.b32.cont [15/16] %v667_v7, 128 }
 0x18f   : > { %684 = vxpose.xlu0.b32.end [16/16] %v668_v8, 128 }
 0x1cf   : > { %v685_v10 = vpop.trf.xlu0 }
 0x1d3   : > { %v686_v11 = vpop.trf.xlu0 }
 0x1d4   : > { %v701_v23 = vadd.f32 %v686_v11, %v685_v10 }
 0x1d7   : > { %v687_v12 = vpop.trf.xlu0 }
 0x1d8   : > { %v702_v26 = vadd.f32 %v701_v23, %v687_v12 }
 0x1db   : > { %v688_v13 = vpop.trf.xlu0 }
 0x1dc   : > { %v703_v28 = vadd.f32 %v702_v26, %v688_v13 }
 0x1df   : > { %v689_v14 = vpop.trf.xlu0 }
 0x1e0   : > { %v704_v29 = vadd.f32 %v703_v28, %v689_v14 }
 0x1e3   : > { %v690_v15 = vpop.trf.xlu0 }
 0x1e4   : > { %v705_v32 = vadd.f32 %v704_v29, %v690_v15 }
 0x1e7   : > { %v691_v16 = vpop.trf.xlu0 }
 0x1e8   : > { %v706_v31 = vadd.f32 %v705_v32, %v691_v16 }
 0x1eb   : > { %v692_v17 = vpop.trf.xlu0 }
 0x1ec   : > { %v707_v34 = vadd.f32 %v706_v31, %v692_v17 }
 0x1ef   : > { %v693_v22 = vpop.trf.xlu0 }
 0x1f0   : > { %v708_v35 = vadd.f32 %v707_v34, %v693_v22 }
 0x1f3   : > { %v694_v27 = vpop.trf.xlu0 }
 0x1f4   : > { %v709_v37 = vadd.f32 %v708_v35, %v694_v27 }
 0x1f7   : > { %v695_v30 = vpop.trf.xlu0 }
 0x1f8   : > { %v710_v38 = vadd.f32 %v709_v37, %v695_v30 }
 0x1fb   : > { %v696_v33 = vpop.trf.xlu0 }
 0x1fc   : > { %v711_v42 = vadd.f32 %v710_v38, %v696_v33 }
 0x1ff   : > { %v697_v36 = vpop.trf.xlu0 }
 0x200   : > { %v712_v43 = vadd.f32 %v711_v42, %v697_v36 }
 0x203   : > { %v698_v39 = vpop.trf.xlu0 }
 0x204   : > { %v713_v47 = vadd.f32 %v712_v43, %v698_v39 }
 0x207   : > { %v699_v46 = vpop.trf.xlu0 }
 0x208   : > { %v714_v48 = vadd.f32 %v713_v47, %v699_v46 }
 0x20b   : > { %v700_v49 = vpop.trf.xlu0 }
 0x20c   : > { %v715_v50 = vadd.f32 %v714_v48, %v700_v49 }
 0x20e   : > { %v716_v51 = vrot.slane %v715_v50, 4 }
 0x210   : > { %v717_v52 = vadd.f32 %v716_v51, %v715_v50 }
 0x212   : > { %v718_v53 = vrot.slane %v717_v52, 2 }
 0x214   : > { %v719_v54 = vadd.f32 %v718_v53, %v717_v52 }
 0x216   : > { %v720_v55 = vrot.slane %v719_v54, 1 }
 0x218   : > { %v721_v56 = vadd.f32 %v720_v55, %v719_v54 }
 0x21a   : > { %v965_v57 = vmul.f32 -1.442695, %v721_v56 }
 0x21c   : > { %1152 = vpow2.f32 %v965_v57 }
 0x229   : > { %v1153_v58 = vpop.eup %1152 }
 0x22a   : > { %v725_v59 = vadd.f32 1.0, %v1153_v58 }
 0x22c   : > { %1154 = vrcp.f32 %v725_v59 }
 0x239   : > { %v1155_v62 = vpop.eup %1154 }
 0x23a   : > { %v745_v63 = vmul.f32 %v1155_v62, %v1576_v6  ;;  %v746_v2 = vmul.f32 %v1155_v62, %v1579_v9  ;;  %v747_v3 = vmul.f32 %v1155_v62, %v1586_v20  ;;  %v748_v4 = vmul.f32 %v1155_v62, %v1589_v21  ;;  %728 = vst [vmem:[%s306_s10] sm:$0x1] %v1155_v62 }
 0x23b   : > { %v749_v5 = vmul.f32 %v1155_v62, %v1594_v24  ;;  %v750_v7 = vmul.f32 %v1155_v62, %v1597_v25  ;;  %v751_v8 = vmul.f32 %v1155_v62, %v1606_v40  ;;  %v752_v10 = vmul.f32 %v1155_v62, %v1609_v41 }
 0x23c   : > { %1251 = shalt.err (!%p1248_p2)
}
 0x23d   : > { %s1252_s9 = scalar_lea.hbm %s1695_s17, 16  ;;  %s1256_s15 = scalar_lea.hbm %s1813_s5, 128 }
 0x23e   : > { %p1253_p1 = scmp.ne.s32.totalorder %s1695_s17, %s1252_s9  ;;  %p1257_p7 = scmp.lt.s32.totalorder %s1695_s17, %s1813_s5 }
 0x23f   : > { %p1258_p8 = scmp.lt.s32.totalorder %s1256_s15, %s1252_s9 }
 0x240   : > { %p1254_p4 = pnand %p1253_p1, %p1831_p11 }
 0x241   : > { %p1259_p10 = por %p1258_p8, %p1257_p7 }
 0x242   : > { %p1255_p3 = pneg %p1254_p4 }
 0x244   : > { %p1260_p6 = pnand %p1259_p10, %p1255_p3 }
 0x246   : > { %1263 = shalt.err (!%p1260_p6)
}
 0x247   : > { %1080 = dma.vmem_to_hbm [thread:$0]  (%p1831_p11), %s1697_s16, 16, %s1695_s17, %s783_s28   ;;  %v753_v6 = vmul.f32 %v1155_v62, %v1614_v44  ;;  %v754_v9 = vmul.f32 %v1155_v62, %v1617_v45  ;;  %v755_v20 = vmul.f32 %v1155_v62, %v1626_v60  ;;  %v756_v21 = vmul.f32 %v1155_v62, %v1629_v61  ;;  %761 = vst [vmem:[%s1701_s29] sm:$0xff] %v745_v63 }
 0x248   : > { %762 = vst [vmem:[%s1701_s29 + $0x8] sm:$0xff] %v746_v2  ;;  %763 = vst [vmem:[%s1701_s29 + $0x10] sm:$0xff] %v747_v3  ;;  %s1746_s17 = scalar_lea.hbm %s1812_s4, %s974_s27  ;;  %v757_v24 = vmul.f32 %v1155_v62, %v1634_v0  ;;  %v758_v25 = vmul.f32 %v1155_v62, %v1637_v1  ;;  %v759_v40 = vmul.f32 %v1155_v62, %v1646_v18  ;;  %s778_s22 = scalar_lea.sflag [#allocation4], %s1548_s2 }
 0x249   : > { %764 = vst [vmem:[%s1701_s29 + $0x18] sm:$0xff] %v748_v4  ;;  %v760_v41 = vmul.f32 %v1155_v62, %v1649_v19  ;;  %765 = vst [vmem:[%s1701_s29 + $0x20] sm:$0xff] %v749_v5  ;;  %s1264_s27 = scalar_lea.vmem %s1750_s11, 2048  ;;  %s1350_s28 = smov [#allocation8]  }
 0x24a   : > { %766 = vst [vmem:[%s1701_s29 + $0x28] sm:$0xff] %v750_v7  ;;  %767 = vst [vmem:[%s1701_s29 + $0x30] sm:$0xff] %v751_v8  ;;  %p1265_p12 = scmp.ne.s32.totalorder %s1750_s11, %s1264_s27  ;;  %s1268_s6 = sshll.u32 %s1350_s28, 4  ;;  %s1269_s6 = int_to_ptr.vmem [resolvable:$false] %s1268_s6 }
 0x24b   : > { %768 = vst [vmem:[%s1701_s29 + $0x38] sm:$0xff] %v752_v10  ;;  %769 = vst [vmem:[%s1701_s29 + $0x40] sm:$0xff] %v753_v6  ;;  %s1270_s7 = scalar_lea.vmem %s1269_s6, 4096  ;;  %p1271_p5 = scmp.lt.s32.totalorder %s1750_s11, %s1269_s6 }
 0x24c   : > { %770 = vst [vmem:[%s1701_s29 + $0x48] sm:$0xff] %v754_v9  ;;  %771 = vst [vmem:[%s1701_s29 + $0x50] sm:$0xff] %v755_v20  ;;  %p1266_p13 = pnand %p1265_p12, %p1831_p11  ;;  %p1272_p9 = scmp.lt.s32.totalorder %s1270_s7, %s1264_s27 }
 0x24d   : > { %772 = vst [vmem:[%s1701_s29 + $0x58] sm:$0xff] %v756_v21  ;;  %773 = vst [vmem:[%s1701_s29 + $0x60] sm:$0xff] %v757_v24 }
 0x24e   : > { %774 = vst [vmem:[%s1701_s29 + $0x68] sm:$0xff] %v758_v25  ;;  %775 = vst [vmem:[%s1701_s29 + $0x70] sm:$0xff] %v759_v40  ;;  %p1267_p0 = pneg %p1266_p13  ;;  %p1273_p2 = por %p1272_p9, %p1271_p5 }
 0x24f   : > { %776 = vst [vmem:[%s1701_s29 + $0x78] sm:$0xff] %v760_v41 }
 0x250   : > { %p1274_p1 = pnand %p1273_p2, %p1267_p0 }
 0x252   : > { %1277 = shalt.err (!%p1274_p1)
}
 0x253   : > { %s1278_s29 = scalar_lea.hbm %s1746_s17, 2048  ;;  %s1282_s9 = scalar_lea.hbm %s1812_s4, 16384 }
 0x254   : > { %p1279_p4 = scmp.ne.s32.totalorder %s1746_s17, %s1278_s29  ;;  %p1283_p8 = scmp.lt.s32.totalorder %s1746_s17, %s1812_s4 }
 0x255   : > { %p1284_p10 = scmp.lt.s32.totalorder %s1282_s9, %s1278_s29 }
 0x256   : > { %p1280_p3 = pnand %p1279_p4, %p1831_p11 }
 0x257   : > { %p1285_p6 = por %p1284_p10, %p1283_p8 }
 0x258   : > { %p1281_p7 = pneg %p1280_p3 }
 0x25a   : > { %p1286_p12 = pnand %p1285_p6, %p1281_p7 }
 0x25c   : > { %1289 = shalt.err (!%p1286_p12)
}
 0x25d   : > { %s1351_s15 = smov 128   ;;  %s1352_s10 = smov 8  }
 0x25e   : > { %1079 = dma.vmem_to_hbm [thread:$0]  (%p1831_p11), %s1750_s11, 2048, %s1746_s17, %s778_s22, %s1351_s15, %s1351_s15, %s1352_s10  }
 0x25f PF: > { %p1104_p13 = scmp.ge.s32.totalorder %s1340_s21, 2  ;;  %s823_s8 = sand.u32 1, %s1328_s18  }
 0x260   : > { %p1832_p0 = scmp.ne.s32.totalorder %s1820_s25, 0  ;;  %s824_s16 = scalar_lea.sflag [#allocation4], %s823_s8 }
 0x262   : > { %p1095_p5 = pnand %p1104_p13, %p1832_p0 }
 0x264   : > { %p1096_p9 = pneg %p1095_p5 }
 0x266   : > { %1319 = dma.done.wait (%p1096_p9), %s824_s16, 2048  }
 0x267   : > { %1321 = vsyncadd (%p1096_p9), %s824_s16, 4294965248  ;;  %s833_s23 = scalar_lea.sflag [#allocation10], %s823_s8 }
 0x268   : > { %1323 = dma.done.wait (%p1096_p9), %s833_s23, 16  }
 0x269   : > { %1325 = vsyncadd (%p1096_p9), %s833_s23, 4294967280  ;;  %p25_p11 = scmp.ge.s32.totalorder %s1436_s30, 10   ;;  %s1833_s18 = smov %s1332_s19 }
 0x26a   : > { %s1834_s19 = smov %s1336_s20  ;;  %s1835_s20 = smov %s1453_s13 }
 0x26b   : > { %s1836_s21 = smov %s1436_s30  ;;  %27 = sbr.rel (!%p25_p11) target bundleno = 12 (0xc), region = 115 }
 0x270   :  { %837 = vsyncpa [#allocation3], 1 }
 0x271   :  { %839 = vsyncpa [#allocation3 + $0x1], 1 }
 0x272   :  { %840 = vsyncpa [#allocation6], 1 }
 0x273   :  { %842 = vsyncpa [#allocation6 + $0x1], 1 }
 0x274   :  { %843 = vsyncpa [#allocation4], 1 }
 0x275   :  { %845 = vsyncpa [#allocation4 + $0x1], 1 }
 0x276   :  { %846 = vsyncpa [#allocation10], 1 }
 0x277   :  { %848 = vsyncpa [#allocation10 + $0x1], 1 }

</bundles_post_ra>
